<compile_context>
chip_gen: v5e
topology: v5e:2x2
jax: 0.10.0
libtpu: 0.0.40
codegen_flags: <defaults>
</compile_context>

<pallas_src>
import functools

import jax
import jax.numpy as jnp
from jax.experimental import pallas as pl
from jax.experimental.pallas import tpu as pltpu

_LANE = 128


def _actor_critic_kernel(x_ref, w1_ref, b1_ref, w2_ref, b2_ref, out_ref, *,
                         output_dim, mxu_dtype):
    """Fused trunk + heads + masked softmax, one lane-dense [TB, 128] store."""
    mxu_dtype = jnp.dtype(mxu_dtype)

    # ---- fused layer 1: x @ [w1_critic | w1_actor]  -> [TB, 2H] -------------
    x = x_ref[...]
    if x.dtype != mxu_dtype:
        x = x.astype(mxu_dtype)
    w1 = w1_ref[...]
    if w1.dtype != mxu_dtype:
        w1 = w1.astype(mxu_dtype)
    h = jnp.dot(x, w1, preferred_element_type=jnp.float32) + b1_ref[...]
    h = jnp.maximum(h, 0.0)                      # ReLU on both trunks, f32 VPU

    # ---- fused layer 2: [hc | ha] @ block-diag(W2) -> [TB, 128] -------------
    # columns [0, output_dim)       : actor logits   (fed by ha rows)
    # column  output_dim            : critic value   (fed by hc rows)
    # columns (output_dim, 128)     : zero padding
    h_mxu = h if h.dtype == mxu_dtype else h.astype(mxu_dtype)
    w2 = w2_ref[...]
    if w2.dtype != mxu_dtype:
        w2 = w2.astype(mxu_dtype)
    z = jnp.dot(h_mxu, w2, preferred_element_type=jnp.float32) + b2_ref[...]

    # ---- masked, numerically-stable softmax over the logit lanes ------------
    col = jax.lax.broadcasted_iota(jnp.int32, z.shape, 1)
    is_logit = col < output_dim
    masked = jnp.where(is_logit, z, -jnp.inf)
    m = jnp.max(masked, axis=1, keepdims=True)
    e = jnp.exp(masked - m)                      # padded / value lanes -> 0
    denom = jnp.sum(e, axis=1, keepdims=True)
    probs = e * pl.reciprocal(denom, approx=False)   # EUP reciprocal, exact

    # probs in logit lanes, raw z (value) elsewhere; single unmasked lane-dense store.
    out_ref[...] = jnp.where(is_logit, probs, z).astype(out_ref.dtype)


def _pack_params(params, output_dim):
    """Pack per-head weights into fused, lane-dense matmul operands."""
    w1c, b1c, w2c, b2c, w1a, b1a, w2a, b2a = params
    hidden = w1c.shape[1]
    n2 = output_dim + 1
    out_pad = max(_LANE, ((n2 + _LANE - 1) // _LANE) * _LANE)

    # Layer 1: columns [critic hidden | actor hidden]
    w1 = jnp.concatenate([w1c, w1a], axis=1)                 # [in, 2H]
    b1 = jnp.concatenate([b1c, b1a], axis=1)                 # [1, 2H]

    # Layer 2: block-diagonal so each head only sees its own trunk.
    w2 = jnp.zeros((2 * hidden, out_pad), w1.dtype)
    w2 = w2.at[hidden:, :output_dim].set(w2a)                # actor trunk -> logits
    w2 = w2.at[:hidden, output_dim:n2].set(w2c)              # critic trunk -> value
    b2 = jnp.zeros((1, out_pad), b1.dtype)
    b2 = b2.at[:, :output_dim].set(b2a)
    b2 = b2.at[:, output_dim:n2].set(b2c)
    return w1, b1, w2, b2, out_pad


@functools.partial(jax.jit, static_argnames=("block_batch", "mxu_dtype"))
def actor_critic_forward(x, params, *, block_batch=512, mxu_dtype=jnp.float32):
    """Fused actor/critic forward. Returns (probs, value).

    `probs` fully parameterizes the Categorical distribution of the PyTorch module.
    `mxu_dtype=jnp.bfloat16` feeds bf16 operands to the MXU (f32 accumulation,
    f32 elementwise math) — the v5e/v6e-friendly lever from the perf review.
    """
    w2a = params[6]
    output_dim = w2a.shape[1]
    B, input_dim = x.shape
    w1, b1, w2, b2, out_pad = _pack_params(params, output_dim)

    # Batch tile: as large as sensible, but (8,128)-friendly. TB*128*f32 double-buffered
    # output + TB*in input is well under the v7x 64 MiB VMEM budget at 512 rows.
    tb = B if B <= block_batch else block_batch
    grid = (pl.cdiv(B, tb),)

    kernel = functools.partial(_actor_critic_kernel,
                               output_dim=output_dim,
                               mxu_dtype=jnp.dtype(mxu_dtype))

    two_h = w1.shape[1]
    itemsize = jnp.dtype(x.dtype).itemsize
    cost = pl.CostEstimate(
        flops=2 * B * input_dim * two_h + 2 * B * two_h * (output_dim + 1),
        transcendentals=B * output_dim,
        bytes_accessed=(x.size + w1.size + b1.size + w2.size + b2.size
                        + B * out_pad) * itemsize,
    )

    packed = pl.pallas_call(
        kernel,
        out_shape=jax.ShapeDtypeStruct((B, out_pad), x.dtype),
        grid=grid,
        in_specs=[
            pl.BlockSpec((tb, input_dim), lambda i: (i, 0)),   # x: tiled over batch
            pl.BlockSpec(w1.shape, lambda i: (0, 0)),          # weights: VMEM-resident
            pl.BlockSpec(b1.shape, lambda i: (0, 0)),
            pl.BlockSpec(w2.shape, lambda i: (0, 0)),
            pl.BlockSpec(b2.shape, lambda i: (0, 0)),
        ],
        out_specs=pl.BlockSpec((tb, out_pad), lambda i: (i, 0)),
        compiler_params=pltpu.CompilerParams(
            dimension_semantics=("parallel",),                 # v7x: shard batch across TCs
        ),
        cost_estimate=cost,
    )(x, w1, b1, w2, b2)

    probs = packed[:, :output_dim]
    value = packed[:, output_dim:output_dim + 1]
    return probs, value


def init_params(key, input_dim, output_dim, hidden_dim, dtype=jnp.float32):
    """PyTorch nn.Linear-style init (U[-1/sqrt(fan_in), 1/sqrt(fan_in)]).

    Weights stored [in_features, out_features]; biases [1, out_features].
    """
    keys = jax.random.split(key, 8)

    def linear(kw, kb, fan_in, fan_out):
        bound = 1.0 / jnp.sqrt(jnp.asarray(fan_in, dtype))
        w = jax.random.uniform(kw, (fan_in, fan_out), dtype, -bound, bound)
        b = jax.random.uniform(kb, (1, fan_out), dtype, -bound, bound)
        return w, b

    w1c, b1c = linear(keys[0], keys[1], input_dim, hidden_dim)   # critic trunk
    w2c, b2c = linear(keys[2], keys[3], hidden_dim, 1)           # critic head
    w1a, b1a = linear(keys[4], keys[5], input_dim, hidden_dim)   # actor trunk
    w2a, b2a = linear(keys[6], keys[7], hidden_dim, output_dim)  # actor head
    return (w1c, b1c, w2c, b2c, w1a, b1a, w2a, b2a)


def _reference_forward(x, params):
    (w1c, b1c, w2c, b2c, w1a, b1a, w2a, b2a) = params
    hc = jnp.maximum(x @ w1c + b1c, 0.0)
    value = hc @ w2c + b2c
    ha = jnp.maximum(x @ w1a + b1a, 0.0)
    logits = ha @ w2a + b2a
    probs = jax.nn.softmax(logits, axis=1)
    return probs, value


if __name__ == "__main__":
    # Small shapes consistent with the module: x is [batch, input_dim].
    batch, input_dim, hidden_dim, output_dim = 8, 16, 32, 4

    key = jax.random.PRNGKey(0)
    k_params, k_x = jax.random.split(key)
    params = init_params(k_params, input_dim, output_dim, hidden_dim)
    x = jax.random.normal(k_x, (batch, input_dim), dtype=jnp.float32)

    # f32 path — bit-accurate vs the pure-JAX reference of the PyTorch forward.
    probs, value = actor_critic_forward(x, params)
    jax.block_until_ready((probs, value))

    probs_ref, value_ref = _reference_forward(x, params)
    assert probs.shape == (batch, output_dim)
    assert value.shape == (batch, 1)
    assert jnp.allclose(probs, probs_ref, atol=1e-5, rtol=1e-5)
    assert jnp.allclose(value, value_ref, atol=1e-5, rtol=1e-5)
    assert jnp.allclose(jnp.sum(probs, axis=1), 1.0, atol=1e-5)

    # bf16-MXU path (v5e/v6e lever): bf16 matmul operands, f32 accumulation and
    # f32 elementwise/softmax math.  Looser tolerance vs the f32 reference.
    probs_bf, value_bf = actor_critic_forward(x, params, mxu_dtype=jnp.bfloat16)
    jax.block_until_ready((probs_bf, value_bf))
    assert jnp.allclose(probs_bf, probs_ref, atol=3e-2, rtol=3e-2)
    assert jnp.allclose(value_bf, value_ref, atol=3e-2, rtol=3e-2)
    assert jnp.allclose(jnp.sum(probs_bf, axis=1), 1.0, atol=1e-3)

    # TODO(synk): torch.distributions.Categorical has no Pallas equivalent; the
    # kernel returns `probs`, which fully parameterizes the distribution.
    print("KERNEL_OK")
</pallas_src>

<mosaic_0001>
module attributes {stable_mosaic.version = 11 : i64} {
  func.func @_actor_critic_kernel(%arg0: i32, %arg1: memref<8x16xf32, #tpu.memory_space<vmem>>, %arg2: memref<16x64xf32, #tpu.memory_space<vmem>>, %arg3: memref<1x64xf32, #tpu.memory_space<vmem>>, %arg4: memref<64x128xf32, #tpu.memory_space<vmem>>, %arg5: memref<1x128xf32, #tpu.memory_space<vmem>>, %arg6: memref<8x128xf32, #tpu.memory_space<vmem>>) attributes {dimension_semantics = [#tpu.dimension_semantics<parallel>], iteration_bounds = array<i64: 1>, scalar_prefetch = 0 : i64, scratch_operands = 0 : i64, tpu.core_type = #tpu.core_type<tc>, window_params = [{transform_indices = @transform_0, window_bounds = array<i64: 8, 16>}, {pipeline_mode = #tpu.pipeline_mode<synchronous>, transform_indices = @transform_1, window_bounds = array<i64: 16, 64>}, {pipeline_mode = #tpu.pipeline_mode<synchronous>, transform_indices = @transform_2, window_bounds = array<i64: 1, 64>}, {pipeline_mode = #tpu.pipeline_mode<synchronous>, transform_indices = @transform_3, window_bounds = array<i64: 64, 128>}, {pipeline_mode = #tpu.pipeline_mode<synchronous>, transform_indices = @transform_4, window_bounds = array<i64: 1, 128>}, {transform_indices = @transform_5, window_bounds = array<i64: 8, 128>}]} {
    %c0 = arith.constant 0 : index
    %c0_0 = arith.constant 0 : index
    %0 = vector.load %arg1[%c0, %c0_0] : memref<8x16xf32, #tpu.memory_space<vmem>>, vector<8x16xf32>
    %c0_1 = arith.constant 0 : index
    %c0_2 = arith.constant 0 : index
    %1 = vector.load %arg2[%c0_1, %c0_2] : memref<16x64xf32, #tpu.memory_space<vmem>>, vector<16x64xf32>
    %cst = arith.constant dense<0.000000e+00> : vector<8x64xf32>
    %2 = tpu.matmul %0, %1, %cst {dimension_numbers = #tpu.dot_dimension_numbers<[1], [0], [0], [1], [0, 0, 1, 1], [], []>} : vector<8x16xf32>, vector<16x64xf32>, vector<8x64xf32> -> vector<8x64xf32>
    %c0_3 = arith.constant 0 : index
    %c0_4 = arith.constant 0 : index
    %3 = vector.load %arg3[%c0_3, %c0_4] : memref<1x64xf32, #tpu.memory_space<vmem>>, vector<1x64xf32>
    %4 = vector.broadcast %3 : vector<1x64xf32> to vector<8x64xf32>
    %5 = arith.addf %2, %4 : vector<8x64xf32>
    %cst_5 = arith.constant 0.000000e+00 : f32
    %6 = vector.broadcast %cst_5 : f32 to vector<8x64xf32>
    %7 = arith.maximumf %5, %6 : vector<8x64xf32>
    %c0_6 = arith.constant 0 : index
    %c0_7 = arith.constant 0 : index
    %8 = vector.load %arg4[%c0_6, %c0_7] : memref<64x128xf32, #tpu.memory_space<vmem>>, vector<64x128xf32>
    %cst_8 = arith.constant dense<0.000000e+00> : vector<8x128xf32>
    %9 = tpu.matmul %7, %8, %cst_8 {dimension_numbers = #tpu.dot_dimension_numbers<[1], [0], [0], [1], [0, 0, 1, 1], [], []>} : vector<8x64xf32>, vector<64x128xf32>, vector<8x128xf32> -> vector<8x128xf32>
    %c0_9 = arith.constant 0 : index
    %c0_10 = arith.constant 0 : index
    %10 = vector.load %arg5[%c0_9, %c0_10] : memref<1x128xf32, #tpu.memory_space<vmem>>, vector<1x128xf32>
    %11 = vector.broadcast %10 : vector<1x128xf32> to vector<8x128xf32>
    %12 = arith.addf %9, %11 : vector<8x128xf32>
    %13 = tpu.iota {dimensions = array<i32: 1>} : vector<8x128xi32>
    %c4_i32 = arith.constant 4 : i32
    %14 = vector.broadcast %c4_i32 : i32 to vector<8x128xi32>
    %15 = arith.cmpi slt, %13, %14 : vector<8x128xi32>
    %cst_11 = arith.constant 0xFF800000 : f32
    %16 = vector.broadcast %cst_11 : f32 to vector<8x128xf32>
    %17 = arith.select %15, %12, %16 : vector<8x128xi1>, vector<8x128xf32>
    %cst_12 = arith.constant dense<0xFF800000> : vector<8xf32>
    %18 = vector.multi_reduction <maximumf>, %17, %cst_12 [1] : vector<8x128xf32> to vector<8xf32>
    %19 = vector.shape_cast %18 : vector<8xf32> to vector<8x1xf32>
    %20 = vector.broadcast %19 : vector<8x1xf32> to vector<8x128xf32>
    %21 = arith.subf %17, %20 : vector<8x128xf32>
    %22 = math.exp %21 : vector<8x128xf32>
    %cst_13 = arith.constant dense<0.000000e+00> : vector<8xf32>
    %23 = vector.multi_reduction <add>, %22, %cst_13 [1] : vector<8x128xf32> to vector<8xf32>
    %24 = vector.shape_cast %23 : vector<8xf32> to vector<8x1xf32>
    %25 = tpu.reciprocal %24 : vector<8x1xf32> -> vector<8x1xf32>
    %26 = vector.broadcast %25 : vector<8x1xf32> to vector<8x128xf32>
    %27 = arith.mulf %22, %26 : vector<8x128xf32>
    %28 = arith.select %15, %27, %12 : vector<8x128xi1>, vector<8x128xf32>
    %c0_14 = arith.constant 0 : index
    %c0_15 = arith.constant 0 : index
    %29 = vector.load %arg6[%c0_14, %c0_15] : memref<8x128xf32, #tpu.memory_space<vmem>>, vector<8x128xf32>
    tpu.vector_store %arg6[%c0_14, %c0_15], %28 {strides = array<i32>} : memref<8x128xf32, #tpu.memory_space<vmem>>, vector<8x128xf32>,
    return
  }
  func.func @transform_0(%arg0: i32) -> (i32, i32) {
    %c0_i32 = arith.constant 0 : i32
    %c0_i32_0 = arith.constant 0 : i32
    return %arg0, %c0_i32 : i32, i32
  }
  func.func @transform_1(%arg0: i32) -> (i32, i32) {
    %c0_i32 = arith.constant 0 : i32
    %c0_i32_0 = arith.constant 0 : i32
    %c0_i32_1 = arith.constant 0 : i32
    return %c0_i32, %c0_i32_0 : i32, i32
  }
  func.func @transform_2(%arg0: i32) -> (i32, i32) {
    %c0_i32 = arith.constant 0 : i32
    %c0_i32_0 = arith.constant 0 : i32
    %c0_i32_1 = arith.constant 0 : i32
    return %c0_i32, %c0_i32_0 : i32, i32
  }
  func.func @transform_3(%arg0: i32) -> (i32, i32) {
    %c0_i32 = arith.constant 0 : i32
    %c0_i32_0 = arith.constant 0 : i32
    %c0_i32_1 = arith.constant 0 : i32
    return %c0_i32, %c0_i32_0 : i32, i32
  }
  func.func @transform_4(%arg0: i32) -> (i32, i32) {
    %c0_i32 = arith.constant 0 : i32
    %c0_i32_0 = arith.constant 0 : i32
    %c0_i32_1 = arith.constant 0 : i32
    return %c0_i32, %c0_i32_0 : i32, i32
  }
  func.func @transform_5(%arg0: i32) -> (i32, i32) {
    %c0_i32 = arith.constant 0 : i32
    %c0_i32_0 = arith.constant 0 : i32
    return %arg0, %c0_i32 : i32, i32
  }
}

</mosaic_0001>

<bundles_post_ra>
// kernel: actor_critic_forward.1
= control target key start
LH: loop header
LB: loop body
LE: loop exit
PB: predicated region body
PF: predicated region fallthrough
CT: control target
= control target key end

     0   :  { %vm27_vm0 = vcmask 130048   ;;  %vm64_vm1 = vcmask 523264   ;;  %v88_v15 = vlaneseq  ;;  %s202_s1 = inlined_call_operand.vmem [shape: f32[16,64], index: 1, kind: input, shape index: {}]   ;;  %s203_s0 = inlined_call_operand.vmem [shape: f32[8,16], index: 0, kind: input, shape index: {}]   ;;  %s204_s3 = inlined_call_operand.vmem [shape: f32[64,128], index: 3, kind: input, shape index: {}]   ;;  %s205_s2 = inlined_call_operand.vmem [shape: f32[1,64], index: 2, kind: input, shape index: {}]   ;;  %s206_s4 = inlined_call_operand.vmem [shape: f32[1,128], index: 4, kind: input, shape index: {}]   ;;  %s207_s5 = inlined_call_operand.vmem [shape: f32[8,128], index: 5, kind: output, shape index: {}]  }
   0x1   :  { %v22_v0 = vld [vmem:[%s202_s1 + $0x8] sm:$0xff]  ;;  %v21_v1 = vld [vmem:[%s202_s1] sm:$0xff]  ;;  %v59_v3 = vld [vmem:[%s204_s3 + $0x38] sm:$0xff] }
   0x2   :  { %45 = vmatpush.msra.mxu0 %v22_v0  ;;  %v20_v2 = vld [vmem:[%s203_s0] sm:$0xff]  ;;  %v58_v4 = vld [vmem:[%s204_s3 + $0x30] sm:$0xff]  ;;  %76 = vmatpush.msra.mxu1 %v59_v3  ;;  %v57_v5 = vld [vmem:[%s204_s3 + $0x28] sm:$0xff]  ;;  %v89_v16 = vand.u32 127, %v88_v15 }
   0x3   :  { %v56_v6 = vld [vmem:[%s204_s3 + $0x20] sm:$0xff]  ;;  %v55_v7 = vld [vmem:[%s204_s3 + $0x18] sm:$0xff]  ;;  %v54_v8 = vld [vmem:[%s204_s3 + $0x10] sm:$0xff] }
   0x4   :  { %46 = vmatpush.msra.mxu0 %v21_v1  ;;  %77 = vmatpush.msra.mxu1 %v58_v4  ;;  %v53_v9 = vld [vmem:[%s204_s3 + $0x8] sm:$0xff]  ;;  %v52_v10 = vld [vmem:[%s204_s3] sm:$0xff]  ;;  %vm90_vm2 = vcmp.lt.s32.totalorder %v89_v16, 4 }
   0x5   :  { %120 = vmatmul.msk.f32.vlgmr.msra.gmra.mxu0 %vm27_vm0, %v20_v2  ;;  %v122_v11 = vld [vmem:[%s205_s2] ss:$0 sm:$0xff] }
   0x6   :  { %78 = vmatpush.msra.mxu1 %v57_v5  ;;  %v123_v17 = vld [vmem:[%s206_s4] ss:$0 sm:$0xff] }
   0x8   :  { %79 = vmatpush.msra.mxu1 %v56_v6 }
   0xa   :  { %80 = vmatpush.msra.mxu1 %v55_v7 }
   0xc   :  { %81 = vmatpush.msra.mxu1 %v54_v8 }
   0xe   :  { %82 = vmatpush.msra.mxu1 %v53_v9 }
  0x10   :  { %83 = vmatpush.msra.mxu1 %v52_v10 }
  0x82   :  { %v48_v12 = vpop.f32.mrf.mxu0 }
  0x83   :  { %v49_v13 = vadd.f32 %v122_v11, %v48_v12 }
  0x85   :  { %v51_v14 = vmax.f32 %v49_v13, 0.0 }
  0x87   :  { %121 = vmatmul.msk.f32.vlgmr.msra.gmra.mxu1 %vm64_vm1, %v51_v14 }
 0x104   :  { %v85_v18 = vpop.f32.mrf.mxu1 }
 0x105   :  { %v86_v19 = vadd.f32 %v123_v17, %v85_v18 }
 0x107   :  { %v91_v20 = vsel %vm90_vm2, %v86_v19, -inf }
 0x108   :  { %92 = vmax.xlane.f32.xlu0 %v91_v20 }
 0x17b   :  { %v93_v21 = vpop.xlane.xlu0 %92 }
 0x17c   :  { %v94_v22 = vsub.f32 %v91_v20, %v93_v21 }
 0x17e   :  { %v95_v23 = vmul.f32 1.442695, %v94_v22 }
 0x180   :  { %124 = vpow2.f32 %v95_v23 }
 0x186   :  { %v125_v24 = vpop.eup %124 }
 0x187   :  { %97 = vadd.xlane.f32.xlu0 %v125_v24 }
 0x1fa   :  { %v98_v25 = vpop.xlane.xlu0 %97 }
 0x1fb   :  { %126 = vrcp.f32 %v98_v25  ;;  %v110_v29 = vand.u32 2147483648, %v98_v25  ;;  %v108_v31 = vand.u32 2147483647, %v98_v25  ;;  %vm104_vm4 = vweird.f32 %v98_v25 }
 0x1fd   :  { %v111_v33 = vor.u32 1.1754944e-38, %v110_v29  ;;  %vm109_vm6 = vcmp.eq.f32.partialorder %v108_v31, 8.507059e+37 }
 0x201   :  { %v127_v26 = vpop.eup %126 }
 0x202   :  { %v100_v27 = vmul.f32 %v127_v26, %v98_v25  ;;  %vm105_vm3 = vweird.f32 %v127_v26 }
 0x203   :  { %vm106_vm5 = vmor %vm104_vm4, %vm105_vm3 }
 0x204   :  { %v101_v28 = vsub.f32 1.0, %v100_v27 }
 0x206   :  { %v102_v30 = vmul.f32 %v127_v26, %v101_v28 }
 0x208   :  { %v103_v32 = vadd.f32 %v127_v26, %v102_v30 }
 0x20a   :  { %v107_v34 = vsel %vm106_vm5, %v127_v26, %v103_v32 }
 0x20b   :  { %v112_v35 = vsel %vm109_vm6, %v111_v33, %v107_v34 }
 0x20c   :  { %v113_v36 = vmul.f32 %v125_v24, %v112_v35 }
 0x20e   :  { %v114_v37 = vsel %vm90_vm2, %v113_v36, %v86_v19 }
 0x20f   :  { %115 = vst [vmem:[%s207_s5] sm:$0xff] %v114_v37 }

</bundles_post_ra>
